<compile_context>
chip_gen: v5e
topology: v5e:2x2
jax: 0.10.0
libtpu: 0.0.40
codegen_flags: <defaults>
</compile_context>

<pallas_src>
import functools
import math

import jax
import jax.numpy as jnp
from jax import lax
from jax.experimental import pallas as pl
from jax.experimental.pallas import tpu as pltpu


def _round_up(x: int, m: int) -> int:
    return ((x + m - 1) // m) * m


def _vmem_ceiling() -> int:
    """Per-generation cap on how much VMEM we are willing to request."""
    try:
        cap = int(getattr(pltpu.get_tpu_info(), "vmem_capacity_bytes", 64 << 20))
    except Exception:
        cap = 64 << 20  # conservative fallback (safe on every generation)
    if cap >= (100 << 20):      # v5e / v6e: 128 MiB physical VMEM
        return 112 << 20
    return 56 << 20             # v7x: 64 MiB physical -> leave headroom


# ---------------------------------------------------------------------------
# Path A: small/moderate vocab — one-hot MXU matmul gather.
# ---------------------------------------------------------------------------
def _onehot_embed_kernel(ids_ref, t_hi_ref, t_lo_ref, out_ref, *, scale):
    # ids_ref : VMEM (TM, 1) int32 — this block's token ids
    # t_hi/lo : VMEM (V, D) bf16   — resident hi/lo split of the f32 table
    # out_ref : VMEM (TM, D)       — dense output block
    ids = ids_ref[...]                                              # (TM, 1)
    tm = ids.shape[0]
    v = t_hi_ref.shape[0]
    lane = lax.broadcasted_iota(jnp.int32, (tm, v), 1)
    one_hot = (lane == ids).astype(jnp.bfloat16)                    # exact 0/1
    # Two bf16 MXU passes reconstruct the f32 row to ~2^-18 relative accuracy;
    # out-of-range ids simply select the zero row (no OOB risk at all).
    acc = jnp.dot(one_hot, t_hi_ref[...], preferred_element_type=jnp.float32)
    acc = acc + jnp.dot(one_hot, t_lo_ref[...], preferred_element_type=jnp.float32)
    out_ref[...] = (acc * scale).astype(out_ref.dtype)


def _embed_onehot(flat_ids, emb_table, n, block_tokens, scale, ceiling):
    vocab_size, d_model = emb_table.shape
    out_dtype = emb_table.dtype
    out_itemsize = jnp.dtype(out_dtype).itemsize

    tm = _round_up(min(block_tokens, _round_up(n, 256)), 256)       # MXU-friendly
    n_pad = _round_up(n, tm)
    if n_pad != n:
        flat_ids = jnp.pad(flat_ids, (0, n_pad - n))                # pad id 0 (trimmed later)
    ids2d = flat_ids.reshape(n_pad, 1)

    # hi/lo bf16 split of the table (exact for bf16 tables; ~2^-18 rel for f32).
    t32 = emb_table.astype(jnp.float32)
    t_hi = t32.astype(jnp.bfloat16)
    t_lo = (t32 - t_hi.astype(jnp.float32)).astype(jnp.bfloat16)

    tbl_bytes = 2 * vocab_size * d_model * 2                        # hi + lo, bf16
    big_table = tbl_bytes > (4 << 20)
    tbl_kwargs = {"pipeline_mode": pl.Buffered(1)} if big_table else {}
    bufcount = 1 if big_table else 2

    needed = (bufcount * tbl_bytes + 2 * tm * d_model * out_itemsize
              + 2 * tm * 4 + (2 << 20))
    if needed > ceiling:
        # TODO(synk): HBM-resident table (memory_space=pl.ANY) + manual DMA gather.
        raise NotImplementedError(
            "Embedding table does not fit in VMEM on this TPU generation.")
    vmem_limit = int(min(max(needed, 32 << 20), ceiling))

    grid_spec = pltpu.PrefetchScalarGridSpec(
        num_scalar_prefetch=0,
        grid=(n_pad // tm,),
        in_specs=[
            pl.BlockSpec((tm, 1), lambda b: (b, 0)),                           # ids block
            pl.BlockSpec((vocab_size, d_model), lambda b: (0, 0), **tbl_kwargs),  # t_hi
            pl.BlockSpec((vocab_size, d_model), lambda b: (0, 0), **tbl_kwargs),  # t_lo
        ],
        out_specs=pl.BlockSpec((tm, d_model), lambda b: (b, 0)),
    )

    return pl.pallas_call(
        functools.partial(_onehot_embed_kernel, scale=scale),
        out_shape=jax.ShapeDtypeStruct((n_pad, d_model), out_dtype),
        grid_spec=grid_spec,
        compiler_params=pltpu.CompilerParams(
            dimension_semantics=("parallel",),   # independent blocks; shards on v7x
            vmem_limit_bytes=vmem_limit,
        ),
    )(ids2d, t_hi, t_lo)


# ---------------------------------------------------------------------------
# Path B: large vocab — VMEM-resident table, grouped scalar gather.
# ---------------------------------------------------------------------------
def _gather_embed_kernel(ids_ref, table_ref, out_ref, *, tm, group, vocab, scale):
    # ids_ref  : SMEM (N_pad,) int32 — scalar-prefetched token ids
    # table_ref: VMEM (V, D)         — resident embedding table
    # out_ref  : VMEM (TM, D)        — dense output block
    base = pl.program_id(0) * tm

    def body(g, carry):
        off = pl.multiple_of(g * group, group)
        # Clamp keeps the dynamic VMEM row read in-bounds (no HW check on VMEM OOB);
        # note this differs from nn.Embedding, which would raise on bad ids.
        rows = [
            table_ref[pl.ds(jnp.clip(ids_ref[base + off + r], 0, vocab - 1), 1), :]
            for r in range(group)
        ]
        # One dense (group, D) store instead of `group` masked 1-sublane stores.
        out_ref[pl.ds(off, group), :] = jnp.concatenate(rows, axis=0)
        return carry

    lax.fori_loop(0, tm // group, body, 0, unroll=2)
    # Single dense scale+cast pass over the whole block (full vregs), hoisted out
    # of the per-token path.  (For bf16 tables: f32 multiply then cast back.)
    out_ref[...] = (out_ref[...].astype(jnp.float32) * scale).astype(out_ref.dtype)


def _embed_gather(flat_ids, emb_table, n, block_tokens, scale, ceiling):
    vocab_size, d_model = emb_table.shape
    out_dtype = emb_table.dtype
    itemsize = jnp.dtype(out_dtype).itemsize
    group = 16 if itemsize <= 2 else 8          # one vreg tile of rows per store

    tm = _round_up(min(block_tokens, _round_up(n, group)), group)
    n_pad = _round_up(n, tm)
    if n_pad != n:
        flat_ids = jnp.pad(flat_ids, (0, n_pad - n))   # pad with id 0 (valid row)

    tbl_bytes = vocab_size * d_model * itemsize
    big_table = tbl_bytes > (4 << 20)
    tbl_kwargs = {"pipeline_mode": pl.Buffered(1)} if big_table else {}
    bufcount = 1 if big_table else 2

    needed = bufcount * tbl_bytes + 2 * tm * d_model * itemsize + (2 << 20)
    if needed > ceiling:
        # TODO(synk): HBM-resident table (memory_space=pl.ANY) + 4-8 deep
        # pltpu.make_async_copy row-gather pipeline for tables beyond VMEM residency.
        raise NotImplementedError(
            "Embedding table does not fit in VMEM on this TPU generation.")
    vmem_limit = int(min(max(needed, 32 << 20), ceiling))

    # TODO(synk): for very long sequences, deliver ids per block via an SMEM
    # BlockSpec instead of whole-array scalar prefetch (SMEM capacity bound).
    grid_spec = pltpu.PrefetchScalarGridSpec(
        num_scalar_prefetch=1,                  # flat ids -> SMEM
        grid=(n_pad // tm,),
        in_specs=[
            pl.BlockSpec((vocab_size, d_model), lambda b, ids: (0, 0), **tbl_kwargs),
        ],
        out_specs=pl.BlockSpec((tm, d_model), lambda b, ids: (b, 0)),
    )

    return pl.pallas_call(
        functools.partial(_gather_embed_kernel, tm=tm, group=group,
                          vocab=vocab_size, scale=scale),
        out_shape=jax.ShapeDtypeStruct((n_pad, d_model), out_dtype),
        grid_spec=grid_spec,
        compiler_params=pltpu.CompilerParams(
            dimension_semantics=("parallel",),
            vmem_limit_bytes=vmem_limit,
        ),
    )(flat_ids, emb_table)


# ---------------------------------------------------------------------------
# Public wrapper: InputEmbeddings.forward equivalent.
# ---------------------------------------------------------------------------
def input_embeddings(token_ids: jax.Array, emb_table: jax.Array,
                     *, block_tokens: int | None = None,
                     onehot_max_vocab: int = 2048) -> jax.Array:
    """Pallas equivalent of InputEmbeddings.forward: emb_table[token_ids]*sqrt(d_model)."""
    B, S = token_ids.shape
    vocab_size, d_model = emb_table.shape
    n = B * S
    scale = math.sqrt(d_model)

    ceiling = _vmem_ceiling()
    if block_tokens is None:
        block_tokens = 1024 if ceiling > (64 << 20) else 512   # smaller on v7x

    flat_ids = token_ids.reshape(n).astype(jnp.int32)

    if vocab_size <= onehot_max_vocab:
        out_flat = _embed_onehot(flat_ids, emb_table, n, block_tokens, scale, ceiling)
    else:
        out_flat = _embed_gather(flat_ids, emb_table, n, block_tokens, scale, ceiling)

    return out_flat[:n].reshape(B, S, d_model)


if __name__ == "__main__":
    key = jax.random.PRNGKey(0)
    k_emb, k_ids, k_emb2, k_ids2 = jax.random.split(key, 4)

    # --- Small vocab (one-hot MXU path) ---
    d_model, vocab_size = 128, 64
    batch, seq = 2, 8
    emb_table = jax.random.normal(k_emb, (vocab_size, d_model), dtype=jnp.float32)
    token_ids = jax.random.randint(k_ids, (batch, seq), 0, vocab_size, dtype=jnp.int32)

    out = jax.block_until_ready(input_embeddings(token_ids, emb_table))
    ref = emb_table[token_ids] * math.sqrt(d_model)
    assert out.shape == (batch, seq, d_model)
    assert out.dtype == emb_table.dtype
    assert jnp.allclose(out, ref, atol=1e-5, rtol=1e-5), \
        float(jnp.max(jnp.abs(out - ref)))

    # --- Large vocab (VMEM-resident grouped-gather path) ---
    d_model2, vocab2 = 128, 4096
    batch2, seq2 = 2, 64
    emb_table2 = jax.random.normal(k_emb2, (vocab2, d_model2), dtype=jnp.float32)
    token_ids2 = jax.random.randint(k_ids2, (batch2, seq2), 0, vocab2, dtype=jnp.int32)

    out2 = jax.block_until_ready(input_embeddings(token_ids2, emb_table2))
    ref2 = emb_table2[token_ids2] * math.sqrt(d_model2)
    assert out2.shape == (batch2, seq2, d_model2)
    assert out2.dtype == emb_table2.dtype
    assert jnp.allclose(out2, ref2, atol=1e-5, rtol=1e-5), \
        float(jnp.max(jnp.abs(out2 - ref2)))

    print("KERNEL_OK")
</pallas_src>

<mosaic_0001>
module attributes {stable_mosaic.version = 11 : i64} {
  func.func @_onehot_embed_kernel(%arg0: i32, %arg1: memref<256x1xi32, #tpu.memory_space<vmem>>, %arg2: memref<64x128xbf16, #tpu.memory_space<vmem>>, %arg3: memref<64x128xbf16, #tpu.memory_space<vmem>>, %arg4: memref<256x128xf32, #tpu.memory_space<vmem>>) attributes {dimension_semantics = [#tpu.dimension_semantics<parallel>], iteration_bounds = array<i64: 1>, scalar_prefetch = 0 : i64, scratch_operands = 0 : i64, tpu.core_type = #tpu.core_type<tc>, window_params = [{transform_indices = @transform_0, window_bounds = array<i64: 256, 1>}, {pipeline_mode = #tpu.pipeline_mode<synchronous>, transform_indices = @transform_1, window_bounds = array<i64: 64, 128>}, {pipeline_mode = #tpu.pipeline_mode<synchronous>, transform_indices = @transform_2, window_bounds = array<i64: 64, 128>}, {transform_indices = @transform_3, window_bounds = array<i64: 256, 128>}]} {
    %c0 = arith.constant 0 : index
    %c0_0 = arith.constant 0 : index
    %0 = vector.load %arg1[%c0, %c0_0] : memref<256x1xi32, #tpu.memory_space<vmem>>, vector<256x1xi32>
    %1 = tpu.iota {dimensions = array<i32: 1>} : vector<256x64xi32>
    %2 = vector.broadcast %0 : vector<256x1xi32> to vector<256x64xi32>
    %3 = arith.cmpi eq, %1, %2 : vector<256x64xi32>
    %4 = arith.extui %3 : vector<256x64xi1> to vector<256x64xi32>
    %5 = arith.sitofp %4 : vector<256x64xi32> to vector<256x64xf32>
    %6 = arith.truncf %5 : vector<256x64xf32> to vector<256x64xbf16>
    %c0_1 = arith.constant 0 : index
    %c0_2 = arith.constant 0 : index
    %7 = vector.load %arg2[%c0_1, %c0_2] : memref<64x128xbf16, #tpu.memory_space<vmem>>, vector<64x128xbf16>
    %cst = arith.constant dense<0.000000e+00> : vector<256x128xf32>
    %8 = tpu.matmul %6, %7, %cst {dimension_numbers = #tpu.dot_dimension_numbers<[1], [0], [0], [1], [0, 0, 1, 1], [], []>} : vector<256x64xbf16>, vector<64x128xbf16>, vector<256x128xf32> -> vector<256x128xf32>
    %c0_3 = arith.constant 0 : index
    %c0_4 = arith.constant 0 : index
    %9 = vector.load %arg3[%c0_3, %c0_4] : memref<64x128xbf16, #tpu.memory_space<vmem>>, vector<64x128xbf16>
    %cst_5 = arith.constant dense<0.000000e+00> : vector<256x128xf32>
    %10 = tpu.matmul %6, %9, %cst_5 {dimension_numbers = #tpu.dot_dimension_numbers<[1], [0], [0], [1], [0, 0, 1, 1], [], []>} : vector<256x64xbf16>, vector<64x128xbf16>, vector<256x128xf32> -> vector<256x128xf32>
    %11 = arith.addf %8, %10 : vector<256x128xf32>
    %cst_6 = arith.constant 11.3137083 : f32
    %12 = vector.broadcast %cst_6 : f32 to vector<256x128xf32>
    %13 = arith.mulf %11, %12 : vector<256x128xf32>
    %c0_7 = arith.constant 0 : index
    %c0_8 = arith.constant 0 : index
    %14 = vector.load %arg4[%c0_7, %c0_8] : memref<256x128xf32, #tpu.memory_space<vmem>>, vector<256x128xf32>
    tpu.vector_store %arg4[%c0_7, %c0_8], %13 {strides = array<i32>} : memref<256x128xf32, #tpu.memory_space<vmem>>, vector<256x128xf32>,
    return
  }
  func.func @transform_0(%arg0: i32) -> (i32, i32) {
    %c0_i32 = arith.constant 0 : i32
    %c0_i32_0 = arith.constant 0 : i32
    return %arg0, %c0_i32 : i32, i32
  }
  func.func @transform_1(%arg0: i32) -> (i32, i32) {
    %c0_i32 = arith.constant 0 : i32
    %c0_i32_0 = arith.constant 0 : i32
    %c0_i32_1 = arith.constant 0 : i32
    return %c0_i32, %c0_i32_0 : i32, i32
  }
  func.func @transform_2(%arg0: i32) -> (i32, i32) {
    %c0_i32 = arith.constant 0 : i32
    %c0_i32_0 = arith.constant 0 : i32
    %c0_i32_1 = arith.constant 0 : i32
    return %c0_i32, %c0_i32_0 : i32, i32
  }
  func.func @transform_3(%arg0: i32) -> (i32, i32) {
    %c0_i32 = arith.constant 0 : i32
    %c0_i32_0 = arith.constant 0 : i32
    return %arg0, %c0_i32 : i32, i32
  }
}

</mosaic_0001>

<bundles_post_ra>
// kernel: tpu_custom_call.1
= control target key start
LH: loop header
LB: loop body
LE: loop exit
PB: predicated region body
PF: predicated region fallthrough
CT: control target
= control target key end

     0   :  { %v777_v3 = vmov 0   ;;  %s1023_s0 = inlined_call_operand.vmem [shape: s32[256,1], index: 0, kind: input, shape index: {}]   ;;  %s1024_s1 = inlined_call_operand.vmem [shape: bf16[64,128], index: 1, kind: input, shape index: {}]   ;;  %s1025_s2 = inlined_call_operand.vmem [shape: bf16[64,128], index: 2, kind: input, shape index: {}]   ;;  %s1026_s3 = inlined_call_operand.hbm [shape: f32[256,128], index: 3, kind: output, shape index: {}]  }
   0x1   :  { %v34_v0 = vld [vmem:[%s1023_s0 + $0x90] sm:$0xff]  ;;  %v32_v1 = vld [vmem:[%s1023_s0 + $0x80] sm:$0xff]  ;;  %750 = vset.pattern.permute.xlu2 %v777_v3  ;;  %749 = vset.pattern.permute.xlu1 %v777_v3 }
   0x2   :  { %v16_v2 = vld [vmem:[%s1023_s0] sm:$0xff]  ;;  %748 = vset.pattern.permute.xlu0 %v777_v3  ;;  %105 = vperm.xlu2 %750, %v34_v0  }
   0x3   :  { %99 = vperm.xlu0 %748, %v32_v1   ;;  %51 = vperm.xlu1 %749, %v16_v2  }
   0x4   :  { %8 = vsyncpa [#allocation3], 0  ;;  %v35_v4 = vld [vmem:[%s1023_s0 + $0x98] sm:$0xff]  ;;  %v33_v5 = vld [vmem:[%s1023_s0 + $0x88] sm:$0xff]  ;;  %v48_v41 = vlaneseq  ;;  %vm298_vm4 = vcmask 523264   ;;  %v778_v48 = vmov 0.0  }
   0x5   :  { %v17_v6 = vld [vmem:[%s1023_s0 + $0x8] sm:$0xff]  ;;  %v36_v7 = vld [vmem:[%s1023_s0 + $0xa0] sm:$0xff]  ;;  %v18_v8 = vld [vmem:[%s1023_s0 + $0x10] sm:$0xff]  ;;  %s619_s12 = sshll.u32 %s1026_s3, 4  ;;  %s780_s13 = smov 128   ;;  %s620_s12 = int_to_ptr.hbm [resolvable:$true] %s619_s12 }
   0x6   :  { %v19_v9 = vld [vmem:[%s1023_s0 + $0x18] sm:$0xff]  ;;  %v21_v10 = vld [vmem:[%s1023_s0 + $0x28] sm:$0xff]  ;;  %v20_v12 = vld [vmem:[%s1023_s0 + $0x20] sm:$0xff]  ;;  %v922_v44 = vand.u32 127, %v48_v41  ;;  %s781_s14 = smov 8  }
   0x7   :  { %v37_v11 = vld [vmem:[%s1023_s0 + $0xa8] sm:$0xff]  ;;  %v22_v13 = vld [vmem:[%s1023_s0 + $0x30] sm:$0xff]  ;;  %v39_v15 = vld [vmem:[%s1023_s0 + $0xb8] sm:$0xff] }
   0x8   :  { %v38_v14 = vld [vmem:[%s1023_s0 + $0xb0] sm:$0xff]  ;;  %v41_v16 = vld [vmem:[%s1023_s0 + $0xc8] sm:$0xff]  ;;  %v23_v17 = vld [vmem:[%s1023_s0 + $0x38] sm:$0xff] }
   0x9   :  { %v40_v18 = vld [vmem:[%s1023_s0 + $0xc0] sm:$0xff]  ;;  %v42_v19 = vld [vmem:[%s1023_s0 + $0xd0] sm:$0xff]  ;;  %v25_v21 = vld [vmem:[%s1023_s0 + $0x48] sm:$0xff] }
   0xa   :  { %108 = vperm.xlu2 %750, %v35_v4   ;;  %v24_v20 = vld [vmem:[%s1023_s0 + $0x40] sm:$0xff]  ;;  %v27_v22 = vld [vmem:[%s1023_s0 + $0x58] sm:$0xff]  ;;  %v26_v24 = vld [vmem:[%s1023_s0 + $0x50] sm:$0xff] }
   0xb   :  { %102 = vperm.xlu0 %748, %v33_v5   ;;  %54 = vperm.xlu1 %749, %v17_v6   ;;  %v43_v23 = vld [vmem:[%s1023_s0 + $0xd8] sm:$0xff]  ;;  %v28_v25 = vld [vmem:[%s1023_s0 + $0x60] sm:$0xff]  ;;  %v45_v27 = vld [vmem:[%s1023_s0 + $0xe8] sm:$0xff] }
   0xc   :  { %v44_v26 = vld [vmem:[%s1023_s0 + $0xe0] sm:$0xff]  ;;  %v47_v28 = vld [vmem:[%s1023_s0 + $0xf8] sm:$0xff]  ;;  %v29_v29 = vld [vmem:[%s1023_s0 + $0x68] sm:$0xff] }
   0xd   :  { %v46_v30 = vld [vmem:[%s1023_s0 + $0xf0] sm:$0xff]  ;;  %v734_v31 = vld [vmem:[%s1025_s2 + $0x18] sm:$0xff]  ;;  %v732_v37 = vld [vmem:[%s1025_s2 + $0x8] sm:$0xff] }
   0xe   :  { %v730_v32 = vld [vmem:[%s1024_s1 + $0x18] sm:$0xff]  ;;  %v30_v33 = vld [vmem:[%s1023_s0 + $0x70] sm:$0xff]  ;;  %351 = vmatpush.bf16.msra.mxu0 %v734_v31  ;;  %735 = vmatpush.bf16.msra.mxu2 %v734_v31  ;;  %v728_v38 = vld [vmem:[%s1024_s1 + $0x8] sm:$0xff] }
   0xf   :  { %v31_v34 = vld [vmem:[%s1023_s0 + $0x78] sm:$0xff]  ;;  %464 = vmatpush.bf16.msra.mxu1 %v730_v32  ;;  %739 = vmatpush.bf16.msra.mxu3 %v730_v32  ;;  %v733_v35 = vld [vmem:[%s1025_s2 + $0x10] sm:$0xff]  ;;  %v731_v39 = vld [vmem:[%s1025_s2] sm:$0xff] }
  0x10   :  { %v729_v36 = vld [vmem:[%s1024_s1 + $0x10] sm:$0xff]  ;;  %v727_v40 = vld [vmem:[%s1024_s1] sm:$0xff]  ;;  %s779_s1 = smov [#allocation2]  }
  0x11   :  { %s617_s2 = sshll.u32 %s779_s1, 4  ;;  %s618_s2 = int_to_ptr.vmem [resolvable:$true] %s617_s2 }
  0x12   :  { %111 = vperm.xlu2 %750, %v36_v7   ;;  %352 = vmatpush.bf16.msra.mxu0 %v733_v35 }
  0x13   :  { %57 = vperm.xlu0 %748, %v18_v8   ;;  %60 = vperm.xlu1 %749, %v19_v9  }
  0x14   :  { %736 = vmatpush.bf16.msra.mxu2 %v733_v35  ;;  %465 = vmatpush.bf16.msra.mxu1 %v729_v36 }
  0x15   :  { %740 = vmatpush.bf16.msra.mxu3 %v729_v36 }
  0x16   :  { %353 = vmatpush.bf16.msra.mxu0 %v732_v37 }
  0x18   :  { %737 = vmatpush.bf16.msra.mxu2 %v732_v37  ;;  %466 = vmatpush.bf16.msra.mxu1 %v728_v38 }
  0x19   :  { %741 = vmatpush.bf16.msra.mxu3 %v728_v38 }
  0x1a   :  { %66 = vperm.xlu2 %750, %v21_v10   ;;  %354 = vmatpush.bf16.msra.mxu0 %v731_v39 }
  0x1b   :  { %114 = vperm.xlu0 %748, %v37_v11   ;;  %63 = vperm.xlu1 %749, %v20_v12  }
  0x1c   :  { %738 = vmatpush.bf16.msra.mxu2 %v731_v39  ;;  %467 = vmatpush.bf16.msra.mxu1 %v727_v40 }
  0x1d   :  { %742 = vmatpush.bf16.msra.mxu3 %v727_v40 }
  0x22   :  { %69 = vperm.xlu2 %750, %v22_v13  }
  0x23   :  { %117 = vperm.xlu0 %748, %v38_v14   ;;  %120 = vperm.xlu1 %749, %v39_v15  }
  0x2a   :  { %126 = vperm.xlu2 %750, %v41_v16  }
  0x2b   :  { %72 = vperm.xlu0 %748, %v23_v17   ;;  %123 = vperm.xlu1 %749, %v40_v18  }
  0x32   :  { %129 = vperm.xlu2 %750, %v42_v19  }
  0x33   :  { %75 = vperm.xlu0 %748, %v24_v20   ;;  %78 = vperm.xlu1 %749, %v25_v21  }
  0x3a   :  { %84 = vperm.xlu2 %750, %v27_v22  }
  0x3b   :  { %132 = vperm.xlu0 %748, %v43_v23   ;;  %81 = vperm.xlu1 %749, %v26_v24  }
  0x42   :  { %87 = vperm.xlu2 %750, %v28_v25  }
  0x43   :  { %135 = vperm.xlu0 %748, %v44_v26   ;;  %138 = vperm.xlu1 %749, %v45_v27  }
  0x4a   :  { %144 = vperm.xlu2 %750, %v47_v28  }
  0x4b   :  { %90 = vperm.xlu0 %748, %v29_v29   ;;  %141 = vperm.xlu1 %749, %v46_v30  }
  0x53   :  { %93 = vperm.xlu0 %748, %v30_v33   ;;  %96 = vperm.xlu1 %749, %v31_v34  }
  0x5c   :  { %v106_v45 = vpop.permute.xlu2 %105 }
  0x5d   :  { %vm164_vm5 = vcmp.eq.s32.totalorder %v922_v44, %v106_v45 }
  0x5e   :  { %v649_v58 = vsel %vm164_vm5, 1.0, %v778_v48 }
  0x64   :  { %v109_v55 = vpop.permute.xlu2 %108 }
  0x65   :  { %vm165_vm6 = vcmp.eq.s32.totalorder %v922_v44, %v109_v55 }
  0x66   :  { %v650_v59 = vsel %vm165_vm6, 1.0, %v778_v48 }
  0x67   :  { %v251_v62 = vpack.c.bf16 %v650_v59, %v649_v58 }
  0x6c   :  { %v112_v0 = vpop.permute.xlu2 %111 }
  0x6d   :  { %vm166_vm11 = vcmp.eq.s32.totalorder %v922_v44, %v112_v0 }
  0x6e   :  { %v651_v7 = vsel %vm166_vm11, 1.0, %v778_v48 }
  0x74   :  { %v67_v3 = vpop.permute.xlu2 %66 }
  0x75   :  { %v100_v42 = vpop.permute.xlu0 %99  ;;  %v52_v43 = vpop.permute.xlu1 %51  ;;  %vm151_vm12 = vcmp.eq.s32.totalorder %v922_v44, %v67_v3 }
  0x76   :  { %vm162_vm0 = vcmp.eq.s32.totalorder %v922_v44, %v100_v42  ;;  %vm146_vm1 = vcmp.eq.s32.totalorder %v922_v44, %v52_v43  ;;  %v636_v8 = vsel %vm151_vm12, 1.0, %v778_v48 }
  0x77   :  { %v647_v49 = vsel %vm162_vm0, 1.0, %v778_v48  ;;  %v631_v50 = vsel %vm146_vm1, 1.0, %v778_v48 }
  0x7c   :  { %v70_v13 = vpop.permute.xlu2 %69 }
  0x7d   :  { %v103_v46 = vpop.permute.xlu0 %102  ;;  %v55_v47 = vpop.permute.xlu1 %54  ;;  %vm152_vm0 = vcmp.eq.s32.totalorder %v922_v44, %v70_v13 }
  0x7e   :  { %vm163_vm2 = vcmp.eq.s32.totalorder %v922_v44, %v103_v46  ;;  %vm147_vm3 = vcmp.eq.s32.totalorder %v922_v44, %v55_v47  ;;  %v637_v18 = vsel %vm152_vm0, 1.0, %v778_v48 }
  0x7f   :  { %v648_v51 = vsel %vm163_vm2, 1.0, %v778_v48  ;;  %v632_v52 = vsel %vm147_vm3, 1.0, %v778_v48 }
  0x80   :  { %v250_v53 = vpack.c.bf16 %v648_v51, %v647_v49  ;;  %v242_v54 = vpack.c.bf16 %v632_v52, %v631_v50 }
  0x82   :  { %679 = vmatmul.msk.bf16.vlgmr.msra.gmra.mxu0 %vm298_vm4, %v242_v54  ;;  %687 = vmatmul.msk.bf16.vlgmr.msra.gmra.mxu2 %vm298_vm4, %v250_v53 }
  0x83   :  { %711 = vmatmul.msk.bf16.vlgmr.msra.gmra.mxu1 %vm298_vm4, %v242_v54  ;;  %719 = vmatmul.msk.bf16.vlgmr.msra.gmra.mxu3 %vm298_vm4, %v250_v53 }
  0x84   :  { %v127_v21 = vpop.permute.xlu2 %126 }
  0x85   :  { %v58_v56 = vpop.permute.xlu0 %57  ;;  %v61_v57 = vpop.permute.xlu1 %60  ;;  %vm171_vm5 = vcmp.eq.s32.totalorder %v922_v44, %v127_v21 }
  0x86   :  { %vm148_vm7 = vcmp.eq.s32.totalorder %v922_v44, %v58_v56  ;;  %vm149_vm8 = vcmp.eq.s32.totalorder %v922_v44, %v61_v57  ;;  %v656_v27 = vsel %vm171_vm5, 1.0, %v778_v48 }
  0x87   :  { %v633_v60 = vsel %vm148_vm7, 1.0, %v778_v48  ;;  %v634_v61 = vsel %vm149_vm8, 1.0, %v778_v48 }
  0x88   :  { %v243_v63 = vpack.c.bf16 %v634_v61, %v633_v60 }
  0x8c   :  { %v130_v28 = vpop.permute.xlu2 %129 }
  0x8d   :  { %v115_v1 = vpop.permute.xlu0 %114  ;;  %v64_v2 = vpop.permute.xlu1 %63  ;;  %vm172_vm8 = vcmp.eq.s32.totalorder %v922_v44, %v130_v28 }
  0x8e   :  { %vm167_vm9 = vcmp.eq.s32.totalorder %v922_v44, %v115_v1  ;;  %vm150_vm10 = vcmp.eq.s32.totalorder %v922_v44, %v64_v2  ;;  %v657_v37 = vsel %vm172_vm8, 1.0, %v778_v48 }
  0x8f   :  { %v652_v4 = vsel %vm167_vm9, 1.0, %v778_v48  ;;  %v635_v5 = vsel %vm150_vm10, 1.0, %v778_v48 }
  0x90   :  { %v252_v9 = vpack.c.bf16 %v652_v4, %v651_v7  ;;  %v244_v10 = vpack.c.bf16 %v636_v8, %v635_v5 }
  0x92   :  { %680 = vmatmul.msk.bf16.gmra.mxu0 %vm298_vm4, %v243_v63  ;;  %688 = vmatmul.msk.bf16.gmra.mxu2 %vm298_vm4, %v251_v62 }
  0x93   :  { %712 = vmatmul.msk.bf16.gmra.mxu1 %vm298_vm4, %v243_v63  ;;  %720 = vmatmul.msk.bf16.gmra.mxu3 %vm298_vm4, %v251_v62 }
  0x94   :  { %v85_v33 = vpop.permute.xlu2 %84 }
  0x95   :  { %v118_v6 = vpop.permute.xlu0 %117  ;;  %v121_v11 = vpop.permute.xlu1 %120  ;;  %vm157_vm9 = vcmp.eq.s32.totalorder %v922_v44, %v85_v33 }
  0x96   :  { %vm168_vm13 = vcmp.eq.s32.totalorder %v922_v44, %v118_v6  ;;  %vm169_vm14 = vcmp.eq.s32.totalorder %v922_v44, %v121_v11  ;;  %v642_v38 = vsel %vm157_vm9, 1.0, %v778_v48 }
  0x97   :  { %v653_v14 = vsel %vm168_vm13, 1.0, %v778_v48  ;;  %v654_v15 = vsel %vm169_vm14, 1.0, %v778_v48 }
  0x98   :  { %v253_v19 = vpack.c.bf16 %v654_v15, %v653_v14 }
  0x9c   :  { %v88_v43 = vpop.permute.xlu2 %87 }
  0x9d   :  { %v73_v12 = vpop.permute.xlu0 %72  ;;  %v124_v17 = vpop.permute.xlu1 %123  ;;  %vm158_vm13 = vcmp.eq.s32.totalorder %v922_v44, %v88_v43 }
  0x9e   :  { %vm153_vm15 = vcmp.eq.s32.totalorder %v922_v44, %v73_v12  ;;  %vm170_vm1 = vcmp.eq.s32.totalorder %v922_v44, %v124_v17  ;;  %v643_v50 = vsel %vm158_vm13, 1.0, %v778_v48 }
  0x9f   :  { %v638_v16 = vsel %vm153_vm15, 1.0, %v778_v48  ;;  %v655_v24 = vsel %vm170_vm1, 1.0, %v778_v48 }
  0xa0   :  { %v245_v20 = vpack.c.bf16 %v638_v16, %v637_v18  ;;  %v254_v29 = vpack.c.bf16 %v656_v27, %v655_v24 }
  0xa2   :  { %681 = vmatmul.msk.bf16.gmra.mxu0 %vm298_vm4, %v244_v10  ;;  %689 = vmatmul.msk.bf16.gmra.mxu2 %vm298_vm4, %v252_v9 }
  0xa3   :  { %713 = vmatmul.msk.bf16.gmra.mxu1 %vm298_vm4, %v244_v10  ;;  %721 = vmatmul.msk.bf16.gmra.mxu3 %vm298_vm4, %v252_v9 }
  0xa4   :  { %v145_v55 = vpop.permute.xlu2 %144 }
  0xa5   :  { %v76_v22 = vpop.permute.xlu0 %75  ;;  %v79_v23 = vpop.permute.xlu1 %78  ;;  %vm177_vm1 = vcmp.eq.s32.totalorder %v922_v44, %v145_v55 }
  0xa6   :  { %vm154_vm2 = vcmp.eq.s32.totalorder %v922_v44, %v76_v22  ;;  %vm155_vm3 = vcmp.eq.s32.totalorder %v922_v44, %v79_v23  ;;  %v662_v59 = vsel %vm177_vm1, 1.0, %v778_v48 }
  0xa7   :  { %v639_v25 = vsel %vm154_vm2, 1.0, %v778_v48  ;;  %v640_v26 = vsel %vm155_vm3, 1.0, %v778_v48 }
  0xa8   :  { %v246_v30 = vpack.c.bf16 %v640_v26, %v639_v25 }
  0xad   :  { %v133_v31 = vpop.permute.xlu0 %132  ;;  %v82_v32 = vpop.permute.xlu1 %81 }
  0xae   :  { %vm173_vm6 = vcmp.eq.s32.totalorder %v922_v44, %v133_v31  ;;  %vm156_vm7 = vcmp.eq.s32.totalorder %v922_v44, %v82_v32 }
  0xaf   :  { %v658_v34 = vsel %vm173_vm6, 1.0, %v778_v48  ;;  %v641_v35 = vsel %vm156_vm7, 1.0, %v778_v48 }
  0xb0   :  { %v255_v39 = vpack.c.bf16 %v658_v34, %v657_v37  ;;  %v247_v40 = vpack.c.bf16 %v642_v38, %v641_v35 }
  0xb2   :  { %682 = vmatmul.msk.bf16.gmra.mxu0 %vm298_vm4, %v245_v20  ;;  %690 = vmatmul.msk.bf16.gmra.mxu2 %vm298_vm4, %v253_v19 }
  0xb3   :  { %714 = vmatmul.msk.bf16.gmra.mxu1 %vm298_vm4, %v245_v20  ;;  %722 = vmatmul.msk.bf16.gmra.mxu3 %vm298_vm4, %v253_v19 }
  0xb5   :  { %v136_v36 = vpop.permute.xlu0 %135  ;;  %v139_v41 = vpop.permute.xlu1 %138 }
  0xb6   :  { %vm174_vm10 = vcmp.eq.s32.totalorder %v922_v44, %v136_v36  ;;  %vm175_vm11 = vcmp.eq.s32.totalorder %v922_v44, %v139_v41 }
  0xb7   :  { %v659_v45 = vsel %vm174_vm10, 1.0, %v778_v48  ;;  %v660_v46 = vsel %vm175_vm11, 1.0, %v778_v48 }
  0xb8   :  { %v256_v51 = vpack.c.bf16 %v660_v46, %v659_v45 }
  0xbd   :  { %v91_v42 = vpop.permute.xlu0 %90  ;;  %v142_v49 = vpop.permute.xlu1 %141 }
  0xbe   :  { %vm159_vm12 = vcmp.eq.s32.totalorder %v922_v44, %v91_v42  ;;  %vm176_vm14 = vcmp.eq.s32.totalorder %v922_v44, %v142_v49 }
  0xbf   :  { %v644_v47 = vsel %vm159_vm12, 1.0, %v778_v48  ;;  %v661_v56 = vsel %vm176_vm14, 1.0, %v778_v48 }
  0xc0   :  { %v248_v52 = vpack.c.bf16 %v644_v47, %v643_v50  ;;  %v257_v60 = vpack.c.bf16 %v662_v59, %v661_v56 }
  0xc2   :  { %683 = vmatmul.msk.bf16.gmra.mxu0 %vm298_vm4, %v246_v30  ;;  %691 = vmatmul.msk.bf16.gmra.mxu2 %vm298_vm4, %v254_v29 }
  0xc3   :  { %715 = vmatmul.msk.bf16.gmra.mxu1 %vm298_vm4, %v246_v30  ;;  %723 = vmatmul.msk.bf16.gmra.mxu3 %vm298_vm4, %v254_v29 }
  0xc5   :  { %v94_v53 = vpop.permute.xlu0 %93  ;;  %v97_v54 = vpop.permute.xlu1 %96 }
  0xc6   :  { %vm160_vm15 = vcmp.eq.s32.totalorder %v922_v44, %v94_v53  ;;  %vm161_vm0 = vcmp.eq.s32.totalorder %v922_v44, %v97_v54 }
  0xc7   :  { %v645_v57 = vsel %vm160_vm15, 1.0, %v778_v48  ;;  %v646_v58 = vsel %vm161_vm0, 1.0, %v778_v48 }
  0xc8   :  { %v249_v61 = vpack.c.bf16 %v646_v58, %v645_v57 }
  0xd2   :  { %684 = vmatmul.msk.bf16.gmra.mxu0 %vm298_vm4, %v247_v40  ;;  %692 = vmatmul.msk.bf16.gmra.mxu2 %vm298_vm4, %v255_v39 }
  0xd3   :  { %716 = vmatmul.msk.bf16.gmra.mxu1 %vm298_vm4, %v247_v40  ;;  %724 = vmatmul.msk.bf16.gmra.mxu3 %vm298_vm4, %v255_v39 }
  0xe2   :  { %685 = vmatmul.msk.bf16.gmra.mxu0 %vm298_vm4, %v248_v52  ;;  %693 = vmatmul.msk.bf16.gmra.mxu2 %vm298_vm4, %v256_v51 }
  0xe3   :  { %717 = vmatmul.msk.bf16.gmra.mxu1 %vm298_vm4, %v248_v52  ;;  %725 = vmatmul.msk.bf16.gmra.mxu3 %vm298_vm4, %v256_v51 }
  0xf2   :  { %686 = vmatmul.msk.bf16.gmra.mxu0 %vm298_vm4, %v249_v61  ;;  %694 = vmatmul.msk.bf16.gmra.mxu2 %vm298_vm4, %v257_v60 }
  0xf3   :  { %718 = vmatmul.msk.bf16.gmra.mxu1 %vm298_vm4, %v249_v61  ;;  %726 = vmatmul.msk.bf16.gmra.mxu3 %vm298_vm4, %v257_v60 }
  0xff   :  { %v356_v62 = vpop.f32.mrf.mxu0 }
 0x100   :  { %v469_v44 = vpop.f32.mrf.mxu1 }
 0x101   :  { %v470_v63 = vadd.f32 %v469_v44, %v356_v62 }
 0x103   :  { %v549_v0 = vmul.f32 11.313708, %v470_v63 }
 0x105   :  { %581 = vst [vmem:[#allocation2] sm:$0xff] %v549_v0  ;;  %v396_v1 = vpop.f32.mrf.mxu2 }
 0x106   :  { %v509_v2 = vpop.f32.mrf.mxu3 }
 0x107   :  { %v510_v3 = vadd.f32 %v509_v2, %v396_v1  ;;  %v358_v4 = vpop.f32.mrf.mxu0 }
 0x108   :  { %v471_v48 = vpop.f32.mrf.mxu1 }
 0x109   :  { %v565_v5 = vmul.f32 11.313708, %v510_v3  ;;  %v472_v6 = vadd.f32 %v471_v48, %v358_v4 }
 0x10b   :  { %597 = vst [vmem:[#allocation2 + $0x80] sm:$0xff] %v565_v5  ;;  %v550_v7 = vmul.f32 11.313708, %v472_v6 }
 0x10d   :  { %582 = vst [vmem:[#allocation2 + $0x8] sm:$0xff] %v550_v7  ;;  %v398_v8 = vpop.f32.mrf.mxu2 }
 0x10e   :  { %v511_v9 = vpop.f32.mrf.mxu3 }
 0x10f   :  { %v512_v10 = vadd.f32 %v511_v9, %v398_v8  ;;  %v361_v11 = vpop.f32.mrf.mxu0 }
 0x110   :  { %v474_v12 = vpop.f32.mrf.mxu1 }
 0x111   :  { %v566_v13 = vmul.f32 11.313708, %v512_v10  ;;  %v475_v14 = vadd.f32 %v474_v12, %v361_v11 }
 0x113   :  { %598 = vst [vmem:[#allocation2 + $0x88] sm:$0xff] %v566_v13  ;;  %v551_v15 = vmul.f32 11.313708, %v475_v14 }
 0x115   :  { %583 = vst [vmem:[#allocation2 + $0x10] sm:$0xff] %v551_v15  ;;  %v401_v16 = vpop.f32.mrf.mxu2 }
 0x116   :  { %v514_v17 = vpop.f32.mrf.mxu3 }
 0x117   :  { %v515_v18 = vadd.f32 %v514_v17, %v401_v16  ;;  %v363_v19 = vpop.f32.mrf.mxu0 }
 0x118   :  { %v476_v20 = vpop.f32.mrf.mxu1 }
 0x119   :  { %v567_v21 = vmul.f32 11.313708, %v515_v18  ;;  %v477_v22 = vadd.f32 %v476_v20, %v363_v19 }
 0x11b   :  { %599 = vst [vmem:[#allocation2 + $0x90] sm:$0xff] %v567_v21  ;;  %v552_v23 = vmul.f32 11.313708, %v477_v22 }
 0x11d   :  { %584 = vst [vmem:[#allocation2 + $0x18] sm:$0xff] %v552_v23  ;;  %v403_v24 = vpop.f32.mrf.mxu2 }
 0x11e   :  { %v516_v25 = vpop.f32.mrf.mxu3 }
 0x11f   :  { %v517_v26 = vadd.f32 %v516_v25, %v403_v24  ;;  %v366_v27 = vpop.f32.mrf.mxu0 }
 0x120   :  { %v479_v28 = vpop.f32.mrf.mxu1 }
 0x121   :  { %v568_v29 = vmul.f32 11.313708, %v517_v26  ;;  %v480_v30 = vadd.f32 %v479_v28, %v366_v27 }
 0x123   :  { %600 = vst [vmem:[#allocation2 + $0x98] sm:$0xff] %v568_v29  ;;  %v553_v31 = vmul.f32 11.313708, %v480_v30 }
 0x125   :  { %585 = vst [vmem:[#allocation2 + $0x20] sm:$0xff] %v553_v31  ;;  %v406_v32 = vpop.f32.mrf.mxu2 }
 0x126   :  { %v519_v33 = vpop.f32.mrf.mxu3 }
 0x127   :  { %v520_v34 = vadd.f32 %v519_v33, %v406_v32  ;;  %v368_v35 = vpop.f32.mrf.mxu0 }
 0x128   :  { %v481_v36 = vpop.f32.mrf.mxu1 }
 0x129   :  { %v569_v37 = vmul.f32 11.313708, %v520_v34  ;;  %v482_v38 = vadd.f32 %v481_v36, %v368_v35 }
 0x12b   :  { %601 = vst [vmem:[#allocation2 + $0xa0] sm:$0xff] %v569_v37  ;;  %v554_v39 = vmul.f32 11.313708, %v482_v38 }
 0x12d   :  { %586 = vst [vmem:[#allocation2 + $0x28] sm:$0xff] %v554_v39  ;;  %v408_v40 = vpop.f32.mrf.mxu2 }
 0x12e   :  { %v521_v41 = vpop.f32.mrf.mxu3 }
 0x12f   :  { %v522_v42 = vadd.f32 %v521_v41, %v408_v40  ;;  %v371_v43 = vpop.f32.mrf.mxu0 }
 0x130   :  { %v484_v45 = vpop.f32.mrf.mxu1 }
 0x131   :  { %v570_v46 = vmul.f32 11.313708, %v522_v42  ;;  %v485_v47 = vadd.f32 %v484_v45, %v371_v43 }
 0x133   :  { %602 = vst [vmem:[#allocation2 + $0xa8] sm:$0xff] %v570_v46  ;;  %v555_v49 = vmul.f32 11.313708, %v485_v47 }
 0x135   :  { %587 = vst [vmem:[#allocation2 + $0x30] sm:$0xff] %v555_v49  ;;  %v411_v50 = vpop.f32.mrf.mxu2 }
 0x136   :  { %v524_v51 = vpop.f32.mrf.mxu3 }
 0x137   :  { %v525_v52 = vadd.f32 %v524_v51, %v411_v50  ;;  %v373_v53 = vpop.f32.mrf.mxu0 }
 0x138   :  { %v486_v54 = vpop.f32.mrf.mxu1 }
 0x139   :  { %v571_v55 = vmul.f32 11.313708, %v525_v52  ;;  %v487_v56 = vadd.f32 %v486_v54, %v373_v53 }
 0x13b   :  { %603 = vst [vmem:[#allocation2 + $0xb0] sm:$0xff] %v571_v55  ;;  %v556_v57 = vmul.f32 11.313708, %v487_v56 }
 0x13d   :  { %588 = vst [vmem:[#allocation2 + $0x38] sm:$0xff] %v556_v57  ;;  %v413_v58 = vpop.f32.mrf.mxu2 }
 0x13e   :  { %v526_v59 = vpop.f32.mrf.mxu3 }
 0x13f   :  { %v527_v60 = vadd.f32 %v526_v59, %v413_v58  ;;  %v376_v61 = vpop.f32.mrf.mxu0 }
 0x140   :  { %v489_v62 = vpop.f32.mrf.mxu1 }
 0x141   :  { %v572_v44 = vmul.f32 11.313708, %v527_v60  ;;  %v490_v63 = vadd.f32 %v489_v62, %v376_v61 }
 0x143   :  { %604 = vst [vmem:[#allocation2 + $0xb8] sm:$0xff] %v572_v44  ;;  %v557_v0 = vmul.f32 11.313708, %v490_v63 }
 0x145   :  { %589 = vst [vmem:[#allocation2 + $0x40] sm:$0xff] %v557_v0  ;;  %v416_v1 = vpop.f32.mrf.mxu2 }
 0x146   :  { %v529_v2 = vpop.f32.mrf.mxu3 }
 0x147   :  { %v530_v3 = vadd.f32 %v529_v2, %v416_v1  ;;  %v378_v4 = vpop.f32.mrf.mxu0 }
 0x148   :  { %v491_v48 = vpop.f32.mrf.mxu1 }
 0x149   :  { %v573_v5 = vmul.f32 11.313708, %v530_v3  ;;  %v492_v6 = vadd.f32 %v491_v48, %v378_v4 }
 0x14b   :  { %605 = vst [vmem:[#allocation2 + $0xc0] sm:$0xff] %v573_v5  ;;  %v558_v7 = vmul.f32 11.313708, %v492_v6 }
 0x14d   :  { %590 = vst [vmem:[#allocation2 + $0x48] sm:$0xff] %v558_v7  ;;  %v418_v8 = vpop.f32.mrf.mxu2 }
 0x14e   :  { %v531_v9 = vpop.f32.mrf.mxu3 }
 0x14f   :  { %v532_v10 = vadd.f32 %v531_v9, %v418_v8  ;;  %v381_v11 = vpop.f32.mrf.mxu0 }
 0x150   :  { %v494_v12 = vpop.f32.mrf.mxu1 }
 0x151   :  { %v574_v13 = vmul.f32 11.313708, %v532_v10  ;;  %v495_v14 = vadd.f32 %v494_v12, %v381_v11 }
 0x153   :  { %606 = vst [vmem:[#allocation2 + $0xc8] sm:$0xff] %v574_v13  ;;  %v559_v15 = vmul.f32 11.313708, %v495_v14 }
 0x155   :  { %591 = vst [vmem:[#allocation2 + $0x50] sm:$0xff] %v559_v15  ;;  %v421_v16 = vpop.f32.mrf.mxu2 }
 0x156   :  { %v534_v17 = vpop.f32.mrf.mxu3 }
 0x157   :  { %v535_v18 = vadd.f32 %v534_v17, %v421_v16  ;;  %v383_v19 = vpop.f32.mrf.mxu0 }
 0x158   :  { %v496_v20 = vpop.f32.mrf.mxu1 }
 0x159   :  { %v575_v21 = vmul.f32 11.313708, %v535_v18  ;;  %v497_v22 = vadd.f32 %v496_v20, %v383_v19 }
 0x15b   :  { %607 = vst [vmem:[#allocation2 + $0xd0] sm:$0xff] %v575_v21  ;;  %v560_v23 = vmul.f32 11.313708, %v497_v22 }
 0x15d   :  { %592 = vst [vmem:[#allocation2 + $0x58] sm:$0xff] %v560_v23  ;;  %v423_v24 = vpop.f32.mrf.mxu2 }
 0x15e   :  { %v536_v25 = vpop.f32.mrf.mxu3 }
 0x15f   :  { %v537_v26 = vadd.f32 %v536_v25, %v423_v24  ;;  %v386_v27 = vpop.f32.mrf.mxu0 }
 0x160   :  { %v499_v28 = vpop.f32.mrf.mxu1 }
 0x161   :  { %v576_v29 = vmul.f32 11.313708, %v537_v26  ;;  %v500_v30 = vadd.f32 %v499_v28, %v386_v27 }
 0x163   :  { %608 = vst [vmem:[#allocation2 + $0xd8] sm:$0xff] %v576_v29  ;;  %v561_v31 = vmul.f32 11.313708, %v500_v30 }
 0x165   :  { %593 = vst [vmem:[#allocation2 + $0x60] sm:$0xff] %v561_v31  ;;  %v426_v32 = vpop.f32.mrf.mxu2 }
 0x166   :  { %v539_v33 = vpop.f32.mrf.mxu3 }
 0x167   :  { %v540_v34 = vadd.f32 %v539_v33, %v426_v32  ;;  %v388_v35 = vpop.f32.mrf.mxu0 }
 0x168   :  { %v501_v36 = vpop.f32.mrf.mxu1 }
 0x169   :  { %v577_v37 = vmul.f32 11.313708, %v540_v34  ;;  %v502_v38 = vadd.f32 %v501_v36, %v388_v35 }
 0x16b   :  { %609 = vst [vmem:[#allocation2 + $0xe0] sm:$0xff] %v577_v37  ;;  %v562_v39 = vmul.f32 11.313708, %v502_v38 }
 0x16d   :  { %594 = vst [vmem:[#allocation2 + $0x68] sm:$0xff] %v562_v39  ;;  %v428_v40 = vpop.f32.mrf.mxu2 }
 0x16e   :  { %v541_v41 = vpop.f32.mrf.mxu3 }
 0x16f   :  { %v542_v42 = vadd.f32 %v541_v41, %v428_v40  ;;  %v391_v43 = vpop.f32.mrf.mxu0 }
 0x170   :  { %v504_v45 = vpop.f32.mrf.mxu1 }
 0x171   :  { %v578_v46 = vmul.f32 11.313708, %v542_v42  ;;  %v505_v47 = vadd.f32 %v504_v45, %v391_v43 }
 0x173   :  { %610 = vst [vmem:[#allocation2 + $0xe8] sm:$0xff] %v578_v46  ;;  %v563_v49 = vmul.f32 11.313708, %v505_v47 }
 0x175   :  { %595 = vst [vmem:[#allocation2 + $0x70] sm:$0xff] %v563_v49  ;;  %v431_v50 = vpop.f32.mrf.mxu2 }
 0x176   :  { %v544_v51 = vpop.f32.mrf.mxu3 }
 0x177   :  { %v545_v52 = vadd.f32 %v544_v51, %v431_v50  ;;  %v393_v53 = vpop.f32.mrf.mxu0 }
 0x178   :  { %v506_v54 = vpop.f32.mrf.mxu1 }
 0x179   :  { %v579_v55 = vmul.f32 11.313708, %v545_v52  ;;  %v507_v56 = vadd.f32 %v506_v54, %v393_v53 }
 0x17b   :  { %611 = vst [vmem:[#allocation2 + $0xf0] sm:$0xff] %v579_v55  ;;  %v564_v57 = vmul.f32 11.313708, %v507_v56 }
 0x17d   :  { %596 = vst [vmem:[#allocation2 + $0x78] sm:$0xff] %v564_v57  ;;  %v433_v58 = vpop.f32.mrf.mxu2 }
 0x17e   :  { %v546_v59 = vpop.f32.mrf.mxu3 }
 0x17f   :  { %v547_v60 = vadd.f32 %v546_v59, %v433_v58 }
 0x181   :  { %v580_v61 = vmul.f32 11.313708, %v547_v60 }
 0x183   :  { %612 = vst [vmem:[#allocation2 + $0xf8] sm:$0xff] %v580_v61 }
 0x184   :  { %625 = dma.vmem_to_hbm [thread:$0]  %s618_s2, 4096, %s620_s12, [#allocation3], %s780_s13, %s780_s13, %s781_s14  }
 0x185   :  { %775 = dma.done.wait [#allocation3], 4096  }
 0x186   :  { %776 = vsyncadd [#allocation3], 4294963200 }
 0x187   :  { %630 = vsyncpa [#allocation3], 1 }

</bundles_post_ra>
